<compile_context>
chip_gen: v5e
topology: v5e:2x2
jax: 0.10.0
libtpu: 0.0.40
codegen_flags: <defaults>
</compile_context>

<pallas_src>
import functools
import math

import jax
import jax.numpy as jnp
from jax.experimental import pallas as pl
from jax.experimental.pallas import tpu as pltpu

NUM_HEADS = 4


def _split_heads(t2d, *, bt, seq, num_heads, dh):
    """(bt*seq, num_heads*dh) -> (num_heads*bt, seq, dh), heads on a batch axis.

    Decomposed into relayouts that lower cleanly on TPU: a 2-D minor transpose,
    reshapes that keep the lane (last) dim, and a swap of the two minor dims.
    """
    t = t2d.T                                     # (D, bt*seq)
    t = t.reshape(num_heads, dh, bt * seq)        # split sublane dim (dh = 8k)
    t = jnp.swapaxes(t, 1, 2)                     # (H, bt*seq, dh)
    return t.reshape(num_heads * bt, seq, dh)     # (H*bt, seq, dh)


def _merge_heads(t3d, *, bt, seq, num_heads, dh):
    """(num_heads*bt, seq, dh) -> (bt*seq, num_heads*dh). Inverse of split."""
    t = t3d.reshape(num_heads, bt * seq, dh)
    t = jnp.swapaxes(t, 1, 2)                     # (H, dh, bt*seq)
    t = t.reshape(num_heads * dh, bt * seq)       # (D, bt*seq)
    return t.T                                    # (bt*seq, D)


def _mha_kernel(x_ref, wqkv_ref, bqkv_ref, wo_ref, bo_ref, o_ref, *,
                num_heads, compute_dtype):
    bt, seq, d_model = x_ref.shape
    dh = d_model // num_heads
    scale = 1.0 / math.sqrt(dh)

    x = x_ref[...].reshape(bt * seq, d_model).astype(compute_dtype)

    # Fused Q/K/V projection: one wide MXU matmul, f32 accumulation, f32 bias.
    qkv = jnp.dot(x, wqkv_ref[...], preferred_element_type=jnp.float32)
    qkv = qkv + bqkv_ref[...]                                  # (bt*seq, 3D) f32

    q = qkv[:, 0 * d_model:1 * d_model]
    k = qkv[:, 1 * d_model:2 * d_model]
    v = qkv[:, 2 * d_model:3 * d_model]

    split = functools.partial(_split_heads, bt=bt, seq=seq,
                              num_heads=num_heads, dh=dh)
    qh = split(q).astype(compute_dtype)                        # (H*bt, seq, dh)
    kh = split(k).astype(compute_dtype)
    vh = split(v).astype(compute_dtype)

    # All heads & batch rows in one batched MXU contraction (no explicit .T).
    s = jnp.einsum("bqd,bkd->bqk", qh, kh,
                   preferred_element_type=jnp.float32) * scale  # (H*bt, seq, seq)

    # Numerically-stable softmax; denominator reciprocal goes to the EUP.
    m = jnp.max(s, axis=-1, keepdims=True)
    p = jnp.exp(s - m)
    denom = jnp.sum(p, axis=-1, keepdims=True)
    p = p * pl.reciprocal(denom, approx=True)

    o = jnp.einsum("bqk,bkd->bqd", p.astype(compute_dtype), vh,
                   preferred_element_type=jnp.float32)          # (H*bt, seq, dh)

    concat = _merge_heads(o, bt=bt, seq=seq, num_heads=num_heads, dh=dh)

    out = jnp.dot(concat.astype(compute_dtype), wo_ref[...],
                  preferred_element_type=jnp.float32) + bo_ref[...]
    o_ref[...] = out.reshape(bt, seq, d_model).astype(o_ref.dtype)


def self_attention_block(feature, params, *, num_heads=NUM_HEADS,
                         batch_tile=8, compute_dtype=jnp.bfloat16):
    """feature: (B, S, D) float32. params: dict of projection weights/biases."""
    B, S, D = feature.shape
    assert D % num_heads == 0

    # Largest batch tile <= batch_tile that divides B (whole batch at toy sizes).
    bt = min(batch_tile, B)
    while B % bt:
        bt -= 1

    # Fuse Q/K/V weights into one (D, 3D) matrix; biases stay f32.
    wqkv = jnp.concatenate([params["wq"], params["wk"], params["wv"]],
                           axis=1).astype(compute_dtype)        # (D, 3D)
    bqkv = jnp.concatenate([params["bq"], params["bk"], params["bv"]]
                           ).reshape(1, 3 * D).astype(jnp.float32)
    wo = params["wo"].astype(compute_dtype)
    bo = params["bo"].reshape(1, D).astype(jnp.float32)

    kernel = functools.partial(_mha_kernel, num_heads=num_heads,
                               compute_dtype=compute_dtype)

    return pl.pallas_call(
        kernel,
        out_shape=jax.ShapeDtypeStruct((B, S, D), feature.dtype),
        grid_spec=pltpu.PrefetchScalarGridSpec(
            num_scalar_prefetch=0,
            grid=(B // bt,),
            in_specs=[
                pl.BlockSpec((bt, S, D), lambda b: (b, 0, 0)),   # activations
                pl.BlockSpec((D, 3 * D), lambda b: (0, 0)),      # fused Wqkv
                pl.BlockSpec((1, 3 * D), lambda b: (0, 0)),      # fused bias
                pl.BlockSpec((D, D), lambda b: (0, 0)),          # Wo
                pl.BlockSpec((1, D), lambda b: (0, 0)),          # bo
            ],
            out_specs=pl.BlockSpec((bt, S, D), lambda b: (b, 0, 0)),
        ),
        compiler_params=pltpu.CompilerParams(
            dimension_semantics=("parallel",)),
    )(feature, wqkv, bqkv, wo, bo)


def _reference(feature, params, *, num_heads=NUM_HEADS,
               compute_dtype=jnp.bfloat16):
    """Plain-JAX reference mirroring layer(feature, feature, feature) with the
    same bf16-at-MXU / f32-accumulation casting as the kernel."""
    B, S, D = feature.shape
    dh = D // num_heads
    cd = compute_dtype

    def mm(x, w):
        return jnp.dot(x.astype(cd), w.astype(cd),
                       preferred_element_type=jnp.float32)

    q = mm(feature, params["wq"]) + params["bq"]
    k = mm(feature, params["wk"]) + params["bk"]
    v = mm(feature, params["wv"]) + params["bv"]

    def split(t):  # (B, S, D) -> (B, H, S, dh)
        return t.reshape(B, S, num_heads, dh).transpose(0, 2, 1, 3)

    qh, kh, vh = split(q), split(k), split(v)
    s = jnp.einsum("bhqd,bhkd->bhqk", qh.astype(cd), kh.astype(cd),
                   preferred_element_type=jnp.float32) / math.sqrt(dh)
    p = jax.nn.softmax(s, axis=-1)
    o = jnp.einsum("bhqk,bhkd->bhqd", p.astype(cd), vh.astype(cd),
                   preferred_element_type=jnp.float32)
    o = o.transpose(0, 2, 1, 3).reshape(B, S, D)
    return mm(o, params["wo"]) + params["bo"]


def _init_params(key, d_model):
    ks = jax.random.split(key, 8)
    scale = 1.0 / math.sqrt(d_model)
    return {
        "wq": jax.random.normal(ks[0], (d_model, d_model), jnp.float32) * scale,
        "bq": jax.random.normal(ks[1], (d_model,), jnp.float32) * 0.01,
        "wk": jax.random.normal(ks[2], (d_model, d_model), jnp.float32) * scale,
        "bk": jax.random.normal(ks[3], (d_model,), jnp.float32) * 0.01,
        "wv": jax.random.normal(ks[4], (d_model, d_model), jnp.float32) * scale,
        "bv": jax.random.normal(ks[5], (d_model,), jnp.float32) * 0.01,
        "wo": jax.random.normal(ks[6], (d_model, d_model), jnp.float32) * scale,
        "bo": jax.random.normal(ks[7], (d_model,), jnp.float32) * 0.01,
    }


if __name__ == "__main__":
    B, S, D = 2, 8, 32   # batch=2, seq=8, hidden=32, heads=4
    key = jax.random.PRNGKey(0)
    k_x, k_p = jax.random.split(key)
    feature = jax.random.normal(k_x, (B, S, D), jnp.float32)
    params = _init_params(k_p, D)

    out = jax.block_until_ready(self_attention_block(feature, params))
    ref = jax.block_until_ready(_reference(feature, params))

    assert out.shape == (B, S, D)
    assert out.dtype == feature.dtype
    max_err = float(jnp.max(jnp.abs(out - ref)))
    assert jnp.allclose(out, ref, atol=2e-2, rtol=2e-2), (
        f"mismatch vs JAX reference (max abs err {max_err:.3e})")

    print("KERNEL_OK")
</pallas_src>

<mosaic_0001>
module attributes {stable_mosaic.version = 11 : i64} {
  func.func @_mha_kernel(%arg0: i32, %arg1: memref<2x8x32xf32, #tpu.memory_space<vmem>>, %arg2: memref<32x96xbf16, #tpu.memory_space<vmem>>, %arg3: memref<1x96xf32, #tpu.memory_space<vmem>>, %arg4: memref<32x32xbf16, #tpu.memory_space<vmem>>, %arg5: memref<1x32xf32, #tpu.memory_space<vmem>>, %arg6: memref<2x8x32xf32, #tpu.memory_space<vmem>>) attributes {dimension_semantics = [#tpu.dimension_semantics<parallel>], iteration_bounds = array<i64: 1>, scalar_prefetch = 0 : i64, scratch_operands = 0 : i64, tpu.core_type = #tpu.core_type<tc>, window_params = [{transform_indices = @transform_0, window_bounds = array<i64: 2, 8, 32>}, {pipeline_mode = #tpu.pipeline_mode<synchronous>, transform_indices = @transform_1, window_bounds = array<i64: 32, 96>}, {pipeline_mode = #tpu.pipeline_mode<synchronous>, transform_indices = @transform_2, window_bounds = array<i64: 1, 96>}, {pipeline_mode = #tpu.pipeline_mode<synchronous>, transform_indices = @transform_3, window_bounds = array<i64: 32, 32>}, {pipeline_mode = #tpu.pipeline_mode<synchronous>, transform_indices = @transform_4, window_bounds = array<i64: 1, 32>}, {transform_indices = @transform_5, window_bounds = array<i64: 2, 8, 32>}]} {
    %c0 = arith.constant 0 : index
    %c0_0 = arith.constant 0 : index
    %c0_1 = arith.constant 0 : index
    %0 = vector.load %arg1[%c0, %c0_0, %c0_1] : memref<2x8x32xf32, #tpu.memory_space<vmem>>, vector<2x8x32xf32>
    %1 = vector.shape_cast %0 : vector<2x8x32xf32> to vector<16x32xf32>
    %2 = arith.truncf %1 : vector<16x32xf32> to vector<16x32xbf16>
    %c0_2 = arith.constant 0 : index
    %c0_3 = arith.constant 0 : index
    %3 = vector.load %arg2[%c0_2, %c0_3] : memref<32x96xbf16, #tpu.memory_space<vmem>>, vector<32x96xbf16>
    %cst = arith.constant dense<0.000000e+00> : vector<16x96xf32>
    %4 = tpu.matmul %2, %3, %cst {dimension_numbers = #tpu.dot_dimension_numbers<[1], [0], [0], [1], [0, 0, 1, 1], [], []>} : vector<16x32xbf16>, vector<32x96xbf16>, vector<16x96xf32> -> vector<16x96xf32>
    %c0_4 = arith.constant 0 : index
    %c0_5 = arith.constant 0 : index
    %5 = vector.load %arg3[%c0_4, %c0_5] : memref<1x96xf32, #tpu.memory_space<vmem>>, vector<1x96xf32>
    %6 = vector.broadcast %5 : vector<1x96xf32> to vector<16x96xf32>
    %7 = arith.addf %4, %6 : vector<16x96xf32>
    %8 = vector.extract_strided_slice %7 {offsets = [0, 0], sizes = [16, 32], strides = [1, 1]} : vector<16x96xf32> to vector<16x32xf32>
    %9 = vector.extract_strided_slice %7 {offsets = [0, 32], sizes = [16, 32], strides = [1, 1]} : vector<16x96xf32> to vector<16x32xf32>
    %10 = vector.extract_strided_slice %7 {offsets = [0, 64], sizes = [16, 32], strides = [1, 1]} : vector<16x96xf32> to vector<16x32xf32>
    %11 = tpu.transpose %8, [1, 0] : vector<16x32xf32> -> vector<32x16xf32>
    %12 = vector.shape_cast %11 : vector<32x16xf32> to vector<4x8x16xf32>
    %13 = tpu.transpose %12, [0, 2, 1] : vector<4x8x16xf32> -> vector<4x16x8xf32>
    %14 = vector.shape_cast %13 : vector<4x16x8xf32> to vector<8x8x8xf32>
    %15 = arith.truncf %14 : vector<8x8x8xf32> to vector<8x8x8xbf16>
    %16 = tpu.transpose %9, [1, 0] : vector<16x32xf32> -> vector<32x16xf32>
    %17 = vector.shape_cast %16 : vector<32x16xf32> to vector<4x8x16xf32>
    %18 = tpu.transpose %17, [0, 2, 1] : vector<4x8x16xf32> -> vector<4x16x8xf32>
    %19 = vector.shape_cast %18 : vector<4x16x8xf32> to vector<8x8x8xf32>
    %20 = arith.truncf %19 : vector<8x8x8xf32> to vector<8x8x8xbf16>
    %21 = tpu.transpose %10, [1, 0] : vector<16x32xf32> -> vector<32x16xf32>
    %22 = vector.shape_cast %21 : vector<32x16xf32> to vector<4x8x16xf32>
    %23 = tpu.transpose %22, [0, 2, 1] : vector<4x8x16xf32> -> vector<4x16x8xf32>
    %24 = vector.shape_cast %23 : vector<4x16x8xf32> to vector<8x8x8xf32>
    %25 = arith.truncf %24 : vector<8x8x8xf32> to vector<8x8x8xbf16>
    "tpu.trace_start"() <{level = 10 : i32, message = "bqd,bkd->bqk"}> : () -> ()
    %cst_6 = arith.constant dense<0.000000e+00> : vector<8x8x8xf32>
    %26 = tpu.matmul %15, %20, %cst_6 {dimension_numbers = #tpu.dot_dimension_numbers<[2], [2], [1], [1], [0, 0, 0, 1, 1, 1], [0], [0]>} : vector<8x8x8xbf16>, vector<8x8x8xbf16>, vector<8x8x8xf32> -> vector<8x8x8xf32>
    "tpu.trace_stop"() : () -> ()
    %cst_7 = arith.constant 0.353553385 : f32
    %27 = vector.broadcast %cst_7 : f32 to vector<8x8x8xf32>
    %28 = arith.mulf %26, %27 : vector<8x8x8xf32>
    %cst_8 = arith.constant dense<0xFF800000> : vector<8x8xf32>
    %29 = vector.multi_reduction <maximumf>, %28, %cst_8 [2] : vector<8x8x8xf32> to vector<8x8xf32>
    %30 = vector.shape_cast %29 : vector<8x8xf32> to vector<8x8x1xf32>
    %31 = vector.broadcast %30 : vector<8x8x1xf32> to vector<8x8x8xf32>
    %32 = arith.subf %28, %31 : vector<8x8x8xf32>
    %33 = math.exp %32 : vector<8x8x8xf32>
    %cst_9 = arith.constant dense<0.000000e+00> : vector<8x8xf32>
    %34 = vector.multi_reduction <add>, %33, %cst_9 [2] : vector<8x8x8xf32> to vector<8x8xf32>
    %35 = vector.shape_cast %34 : vector<8x8xf32> to vector<8x8x1xf32>
    %36 = tpu.reciprocal %35 {approx = true} : vector<8x8x1xf32> -> vector<8x8x1xf32>
    %37 = vector.broadcast %36 : vector<8x8x1xf32> to vector<8x8x8xf32>
    %38 = arith.mulf %33, %37 : vector<8x8x8xf32>
    %39 = arith.truncf %38 : vector<8x8x8xf32> to vector<8x8x8xbf16>
    "tpu.trace_start"() <{level = 10 : i32, message = "bqk,bkd->bqd"}> : () -> ()
    %cst_10 = arith.constant dense<0.000000e+00> : vector<8x8x8xf32>
    %40 = tpu.matmul %39, %25, %cst_10 {dimension_numbers = #tpu.dot_dimension_numbers<[2], [1], [1], [2], [0, 0, 0, 1, 1, 2], [0], [0]>} : vector<8x8x8xbf16>, vector<8x8x8xbf16>, vector<8x8x8xf32> -> vector<8x8x8xf32>
    "tpu.trace_stop"() : () -> ()
    %41 = vector.shape_cast %40 : vector<8x8x8xf32> to vector<4x16x8xf32>
    %42 = tpu.transpose %41, [0, 2, 1] : vector<4x16x8xf32> -> vector<4x8x16xf32>
    %43 = vector.shape_cast %42 : vector<4x8x16xf32> to vector<32x16xf32>
    %44 = tpu.transpose %43, [1, 0] : vector<32x16xf32> -> vector<16x32xf32>
    %45 = arith.truncf %44 : vector<16x32xf32> to vector<16x32xbf16>
    %c0_11 = arith.constant 0 : index
    %c0_12 = arith.constant 0 : index
    %46 = vector.load %arg4[%c0_11, %c0_12] : memref<32x32xbf16, #tpu.memory_space<vmem>>, vector<32x32xbf16>
    %cst_13 = arith.constant dense<0.000000e+00> : vector<16x32xf32>
    %47 = tpu.matmul %45, %46, %cst_13 {dimension_numbers = #tpu.dot_dimension_numbers<[1], [0], [0], [1], [0, 0, 1, 1], [], []>} : vector<16x32xbf16>, vector<32x32xbf16>, vector<16x32xf32> -> vector<16x32xf32>
    %c0_14 = arith.constant 0 : index
    %c0_15 = arith.constant 0 : index
    %48 = vector.load %arg5[%c0_14, %c0_15] : memref<1x32xf32, #tpu.memory_space<vmem>>, vector<1x32xf32>
    %49 = vector.broadcast %48 : vector<1x32xf32> to vector<16x32xf32>
    %50 = arith.addf %47, %49 : vector<16x32xf32>
    %51 = vector.shape_cast %50 : vector<16x32xf32> to vector<2x8x32xf32>
    %c0_16 = arith.constant 0 : index
    %c0_17 = arith.constant 0 : index
    %c0_18 = arith.constant 0 : index
    %52 = vector.load %arg6[%c0_16, %c0_17, %c0_18] : memref<2x8x32xf32, #tpu.memory_space<vmem>>, vector<2x8x32xf32>
    tpu.vector_store %arg6[%c0_16, %c0_17, %c0_18], %51 {strides = array<i32>} : memref<2x8x32xf32, #tpu.memory_space<vmem>>, vector<2x8x32xf32>,
    return
  }
  func.func @transform_0(%arg0: i32) -> (i32, i32, i32) {
    %c0_i32 = arith.constant 0 : i32
    %c0_i32_0 = arith.constant 0 : i32
    %c0_i32_1 = arith.constant 0 : i32
    return %arg0, %c0_i32, %c0_i32_0 : i32, i32, i32
  }
  func.func @transform_1(%arg0: i32) -> (i32, i32) {
    %c0_i32 = arith.constant 0 : i32
    %c0_i32_0 = arith.constant 0 : i32
    %c0_i32_1 = arith.constant 0 : i32
    return %c0_i32, %c0_i32_0 : i32, i32
  }
  func.func @transform_2(%arg0: i32) -> (i32, i32) {
    %c0_i32 = arith.constant 0 : i32
    %c0_i32_0 = arith.constant 0 : i32
    %c0_i32_1 = arith.constant 0 : i32
    return %c0_i32, %c0_i32_0 : i32, i32
  }
  func.func @transform_3(%arg0: i32) -> (i32, i32) {
    %c0_i32 = arith.constant 0 : i32
    %c0_i32_0 = arith.constant 0 : i32
    %c0_i32_1 = arith.constant 0 : i32
    return %c0_i32, %c0_i32_0 : i32, i32
  }
  func.func @transform_4(%arg0: i32) -> (i32, i32) {
    %c0_i32 = arith.constant 0 : i32
    %c0_i32_0 = arith.constant 0 : i32
    %c0_i32_1 = arith.constant 0 : i32
    return %c0_i32, %c0_i32_0 : i32, i32
  }
  func.func @transform_5(%arg0: i32) -> (i32, i32, i32) {
    %c0_i32 = arith.constant 0 : i32
    %c0_i32_0 = arith.constant 0 : i32
    %c0_i32_1 = arith.constant 0 : i32
    return %arg0, %c0_i32, %c0_i32_0 : i32, i32, i32
  }
}

</mosaic_0001>

<bundles_post_ra>
// kernel: tpu_custom_call.1
= control target key start
LH: loop header
LB: loop body
LE: loop exit
PB: predicated region body
PF: predicated region fallthrough
CT: control target
= control target key end

     0   :  { %10 = vsyncpa [#allocation3], 0  ;;  %s1713_s0 = inlined_call_operand.hbm [shape: f32[2,8,32], index: 0, kind: input, shape index: {}]   ;;  %s1714_s1 = inlined_call_operand.hbm [shape: bf16[32,96], index: 1, kind: input, shape index: {}]   ;;  %s1715_s2 = inlined_call_operand.vmem [shape: f32[1,96], index: 2, kind: input, shape index: {}]   ;;  %s1716_s3 = inlined_call_operand.hbm [shape: bf16[32,32], index: 3, kind: input, shape index: {}]   ;;  %s1717_s4 = inlined_call_operand.vmem [shape: f32[1,32], index: 4, kind: input, shape index: {}]   ;;  %s1718_s5 = inlined_call_operand.hbm [shape: f32[2,8,32], index: 5, kind: output, shape index: {}]  }
   0x1   :  { %11 = vsyncpa [#allocation6], 0  ;;  %s30_s20 = sshll.u32 %s1714_s1, 4  ;;  %s31_s20 = int_to_ptr.hbm [resolvable:$true] %s30_s20 }
   0x2   :  { %12 = vsyncpa [#allocation4], 0  ;;  %s1561_s21 = smov [#allocation5]   ;;  %s17_s25 = sshll.u32 %s1713_s0, 4  ;;  %s18_s25 = int_to_ptr.hbm [resolvable:$true] %s17_s25 }
   0x3   :  { %s32_s22 = sshll.u32 %s1561_s21, 4  ;;  %s1562_s26 = smov 64   ;;  %s33_s22 = int_to_ptr.vmem [resolvable:$true] %s32_s22 }
   0x4   :  { %s1563_s27 = smov 4   ;;  %s1564_s28 = smov [#allocation2]  }
   0x5   :  { %38 = dma.hbm_to_vmem [thread:$0]  %s31_s20, 256, %s33_s22, [#allocation6], %s1562_s26, %s1562_s26, %s1563_s27  }
   0x6   :  { %s19_s29 = sshll.u32 %s1564_s28, 4  ;;  %s1565_s30 = smov 128   ;;  %s20_s29 = int_to_ptr.vmem [resolvable:$true] %s19_s29 }
   0x7   :  { %s1566_s1 = smov 8   ;;  %s45_s8 = sshll.u32 %s1716_s3, 4  ;;  %s46_s8 = int_to_ptr.hbm [resolvable:$true] %s45_s8 }
   0x8   :  { %25 = dma.hbm_to_vmem [thread:$0]  %s18_s25, 256, %s20_s29, [#allocation3], %s1565_s30, %s1565_s30, %s1566_s1  }
   0x9   :  { %s1567_s0 = smov [#allocation7]  }
   0xa   :  { %s47_s9 = sshll.u32 %s1567_s0, 4  ;;  %s48_s9 = int_to_ptr.vmem [resolvable:$true] %s47_s9 }
   0xb   :  { %53 = dma.hbm_to_vmem [thread:$0]  %s46_s8, 256, %s48_s9, [#allocation6], %s1562_s26, %s1562_s26, %s1563_s27  }
   0xc   :  { %1555 = dma.done.wait [#allocation3], 256  }
   0xd   :  { %1556 = vsyncadd [#allocation3], 4294967040 }
   0xe   :  { %1557 = dma.done.wait [#allocation6], 512  }
   0xf   :  { %1558 = vsyncadd [#allocation6], 4294966784  ;;  %v1293_v0 = vld [vmem:[#allocation5 + $0x8] sm:$0xff]  ;;  %v1292_v1 = vld [vmem:[#allocation5] sm:$0xff]  ;;  %vm92_vm0 = vcmask 261120   ;;  %s1568_s11 = smov 96  }
  0x10   :  { %102 = vmatpush.bf16.msra.mxu0 %v1293_v0  ;;  %v69_v2 = vld [vmem:[#allocation2] sm:$0xff]  ;;  %v70_v3 = vld [vmem:[#allocation2 + $0x8] sm:$0xff]  ;;  %vm628_vm1 = vcmask 64512   ;;  %vm888_vm2 = vcmask 1043456   ;;  %s1569_s13 = smov [#allocation8]   ;;  %s1244_s17 = sshll.u32 %s1718_s5, 4  ;;  %s1245_s17 = int_to_ptr.hbm [resolvable:$true] %s1244_s17 }
  0x11   :  { %v71_v4 = vpack.c.bf16 %v70_v3, %v69_v2  ;;  %v1425_v5 = vld [vmem:[%s1715_s2] ss:$0 sm:$0xff]  ;;  %s1242_s14 = sshll.u32 %s1569_s13, 4  ;;  %s1243_s14 = int_to_ptr.vmem [resolvable:$true] %s1242_s14 }
  0x14   :  { %103 = vmatpush.bf16.msra.mxu0 %v1292_v1 }
  0x17   :  { %1266 = vmatmul.msk.bf16.vlgmr.msra.gmra.mxu0 %vm92_vm0, %v71_v4 }
  0x94   :  { %v105_v6 = vpop.f32.mrf.mxu0 }
  0x95   :  { %v106_v7 = vadd.f32 %v1425_v5, %v105_v6 }
  0x97   :  { %280 = vrot.lane.b32.xlu0 %v106_v7, %s1568_s11 }
  0x9c   :  { %v107_v8 = vpop.f32.mrf.mxu0 }
  0x9d   :  { %v108_v9 = vadd.f32 %v1425_v5, %v107_v8 }
  0x9f   :  { %282 = vrot.lane.b32.xlu0 %v108_v9, %s1568_s11  ;;  %v1378_v30 = vpack.i.bf16 %v108_v9, %v106_v7 }
 0x109   :  { %v281_v10 = vpop.permute.xlu0 %280 }
 0x10a   :  { %v1306_v11 = vpack.i.bf16 %v106_v7, %v281_v10 }
 0x10c   :  { %1307 = vxpose.xlu1.b32.start [1/2] (short) (narrow) %v1306_v11, 32 }
 0x111   :  { %v283_v12 = vpop.permute.xlu0 %282 }
 0x112   :  { %v1308_v13 = vpack.i.bf16 %v108_v9, %v283_v12 }
 0x114   :  { %1309 = vxpose.xlu1.b32.end [2/2] (short) (narrow) %v1308_v13, 32 }
 0x1b0   :  { %v1310_v14 = vpop.trf.xlu1 }
 0x1b1   :  { %v1311_v17 = vunpack.i.l.bf16 %v1310_v14  ;;  %v1314_v26 = vunpack.i.h.bf16 %v1310_v14 }
 0x1b8   :  { %v1315_v15 = vpop.trf.xlu1 }
 0x1b9   :  { %v1316_v16 = vunpack.i.l.bf16 %v1315_v15  ;;  %v1319_v23 = vunpack.i.h.bf16 %v1315_v15 }
 0x1bb   :  { %v1330_v18 = vpack.i.bf16 %v1316_v16, %v1311_v17  ;;  %v1342_v29 = vpack.i.bf16 %v1319_v23, %v1314_v26 }
 0x1bd   :  { %1331 = vxpose.xlu2.b32.start.end [1/1] (short) (narrow) %v1330_v18, 16 }
 0x1c0   :  { %v1320_v19 = vpop.trf.xlu1 }
 0x1c1   :  { %v1324_v21 = vunpack.i.h.bf16 %v1320_v19  ;;  %v1321_v22 = vunpack.i.l.bf16 %v1320_v19 }
 0x1c8   :  { %v1325_v20 = vpop.trf.xlu1 }
 0x1c9   :  { %v1329_v24 = vunpack.i.h.bf16 %v1325_v20  ;;  %v1326_v25 = vunpack.i.l.bf16 %v1325_v20 }
 0x1cb   :  { %v1366_v27 = vpack.i.bf16 %v1329_v24, %v1324_v21  ;;  %v1354_v28 = vpack.i.bf16 %v1326_v25, %v1321_v22 }
 0x1cd   :  { %1367 = vxpose.xlu1.b32.start.end [1/1] (short) (narrow) %v1366_v27, 16  ;;  %1355 = vxpose.xlu0.b32.start.end [1/1] (short) (narrow) %v1354_v28, 16 }
 0x1ce   :  { %1343 = vxpose.xlu2.b32.start.end [1/1] (short) (narrow) %v1342_v29, 16 }
 0x22f   :  { %1379 = vrot.lane.b32.xlu1 %v1378_v30, %s1562_s26 }
 0x256   :  { %v1332_v31 = vpop.trf.xlu2 }
 0x257   :  { %v1333_v32 = vunpack.i.l.bf16 %v1332_v31  ;;  %v1336_v33 = vunpack.i.h.bf16 %v1332_v31 }
 0x259   :  { %v446_v34 = vpack.c.bf16 %v1333_v32, %v1333_v32  ;;  %v448_v35 = vpack.c.bf16 %v1336_v33, %v1336_v33 }
 0x25b   :  { %v633_v36 = vsel %vm628_vm1, %v446_v34, 0  ;;  %v671_v37 = vsel %vm628_vm1, %v448_v35, 0 }
 0x25c   :  { %642 = vmatpush.bf16.xpose.msra.mxu1 %v633_v36  ;;  %680 = vmatpush.bf16.xpose.msra.mxu3 %v671_v37 }
 0x25e   :  { %v1337_v38 = vpop.trf.xlu2 }
 0x25f   :  { %v1338_v39 = vunpack.i.l.bf16 %v1337_v38  ;;  %v1341_v40 = vunpack.i.h.bf16 %v1337_v38 }
 0x261   :  { %v447_v41 = vpack.c.bf16 %v1338_v39, %v1338_v39  ;;  %v449_v42 = vpack.c.bf16 %v1341_v40, %v1341_v40 }
 0x263   :  { %v652_v43 = vsel %vm628_vm1, %v447_v41, 0  ;;  %v690_v44 = vsel %vm628_vm1, %v449_v42, 0 }
 0x264   :  { %661 = vmatpush.bf16.xpose.msra.mxu2 %v652_v43  ;;  %699 = vmatpush.bf16.xpose.msrb.mxu0 %v690_v44 }
 0x267   :  { %v1344_v45 = vpop.trf.xlu2 }
 0x268   :  { %v1345_v46 = vunpack.i.l.bf16 %v1344_v45  ;;  %v1348_v47 = vunpack.i.h.bf16 %v1344_v45 }
 0x26a   :  { %v270_v48 = vpack.c.bf16 %v1345_v46, %v1345_v46  ;;  %v272_v49 = vpack.c.bf16 %v1348_v47, %v1348_v47 }
 0x26c   :  { %1267 = vmatmul.msk.bf16.vlgmr.msra.gmra.mxu1 %vm628_vm1, %v270_v48  ;;  %1269 = vmatmul.msk.bf16.vlgmr.msra.gmra.mxu3 %vm628_vm1, %v272_v49 }
 0x26f   :  { %v1349_v50 = vpop.trf.xlu2 }
 0x270   :  { %v1353_v51 = vunpack.i.h.bf16 %v1349_v50  ;;  %v1350_v52 = vunpack.i.l.bf16 %v1349_v50 }
 0x271   :  { %v1356_v53 = vpop.trf.xlu0  ;;  %v1368_v54 = vpop.trf.xlu1 }
 0x272   :  { %v273_v55 = vpack.c.bf16 %v1353_v51, %v1353_v51  ;;  %v271_v56 = vpack.c.bf16 %v1350_v52, %v1350_v52  ;;  %v1357_v57 = vunpack.i.l.bf16 %v1356_v53  ;;  %v1360_v58 = vunpack.i.h.bf16 %v1356_v53 }
 0x273   :  { %v1372_v63 = vunpack.i.h.bf16 %v1368_v54  ;;  %v1369_v0 = vunpack.i.l.bf16 %v1368_v54 }
 0x274   :  { %1268 = vmatmul.msk.bf16.vlgmr.msra.gmra.mxu2 %vm628_vm1, %v271_v56  ;;  %1270 = vmatmul.msk.bf16.vlgmr.msrb.gmra.mxu0 %vm628_vm1, %v273_v55  ;;  %v450_v59 = vpack.c.bf16 %v1357_v57, %v1357_v57  ;;  %v452_v60 = vpack.c.bf16 %v1360_v58, %v1360_v58 }
 0x275   :  { %v276_v5 = vpack.c.bf16 %v1372_v63, %v1372_v63  ;;  %v274_v6 = vpack.c.bf16 %v1369_v0, %v1369_v0 }
 0x276   :  { %v709_v61 = vsel %vm628_vm1, %v450_v59, 0  ;;  %v747_v62 = vsel %vm628_vm1, %v452_v60, 0 }
 0x277   :  { %718 = vmatpush.bf16.xpose.msrb.mxu1 %v709_v61  ;;  %756 = vmatpush.bf16.xpose.msrb.mxu3 %v747_v62 }
 0x279   :  { %v1361_v1 = vpop.trf.xlu0  ;;  %v1373_v4 = vpop.trf.xlu1 }
 0x27a   :  { %v1365_v2 = vunpack.i.h.bf16 %v1361_v1  ;;  %v1362_v3 = vunpack.i.l.bf16 %v1361_v1  ;;  %v1377_v11 = vunpack.i.h.bf16 %v1373_v4  ;;  %v1374_v12 = vunpack.i.l.bf16 %v1373_v4 }
 0x27c   :  { %v451_v7 = vpack.c.bf16 %v1362_v3, %v1362_v3  ;;  %v453_v8 = vpack.c.bf16 %v1365_v2, %v1365_v2  ;;  %v277_v13 = vpack.c.bf16 %v1377_v11, %v1377_v11  ;;  %v275_v14 = vpack.c.bf16 %v1374_v12, %v1374_v12 }
 0x27e   :  { %v728_v9 = vsel %vm628_vm1, %v451_v7, 0  ;;  %v766_v10 = vsel %vm628_vm1, %v453_v8, 0  ;;  %1271 = vmatmul.msk.bf16.vlgmr.msrb.gmra.mxu1 %vm628_vm1, %v274_v6  ;;  %1273 = vmatmul.msk.bf16.vlgmr.msrb.gmra.mxu3 %vm628_vm1, %v276_v5 }
 0x27f   :  { %737 = vmatpush.bf16.xpose.msrb.mxu2 %v728_v9  ;;  %775 = vmatpush.bf16.xpose.msra.mxu0 %v766_v10 }
 0x286   :  { %1272 = vmatmul.msk.bf16.vlgmr.msrb.gmra.mxu2 %vm628_vm1, %v275_v14  ;;  %1274 = vmatmul.msk.bf16.vlgmr.msra.gmra.mxu0 %vm628_vm1, %v277_v13 }
 0x2a1   :  { %v1380_v47 = vpop.permute.xlu1 %1379 }
 0x2a2   :  { %v1381_v48 = vunpack.i.l.bf16 %v1380_v47  ;;  %v1382_v49 = vunpack.i.h.bf16 %v1380_v47 }
 0x2e9   :  { %v644_v15 = vpop.f32.mrf.mxu1 }
 0x2ea   :  { %v781_v16 = vmul.f32 0.35355338, %v644_v15 }
 0x2ec   :  { %v789_v17 = vsel %vm628_vm1, %v781_v16, -inf }
 0x2ed   :  { %790 = vmax.xlane.f32.xlu0 %v789_v17 }
 0x2ef   :  { %v682_v18 = vpop.f32.mrf.mxu3 }
 0x2f0   :  { %v783_v19 = vmul.f32 0.35355338, %v682_v18 }
 0x2f1   :  { %v646_v20 = vpop.f32.mrf.mxu1  ;;  %v701_v21 = vpop.f32.mrf.mxu0 }
 0x2f2   :  { %v795_v22 = vsel %vm628_vm1, %v783_v19, -inf  ;;  %v784_v23 = vmul.f32 0.35355338, %v701_v21 }
 0x2f3   :  { %796 = vmax.xlane.f32.xlu1 %v795_v22 }
 0x2f4   :  { %v798_v27 = vsel %vm628_vm1, %v784_v23, -inf }
 0x2f7   :  { %v663_v24 = vpop.f32.mrf.mxu2  ;;  %v684_v25 = vpop.f32.mrf.mxu3 }
 0x2f8   :  { %v782_v26 = vmul.f32 0.35355338, %v663_v24 }
 0x2f9   :  { %v703_v28 = vpop.f32.mrf.mxu0 }
 0x2fa   :  { %v792_v29 = vsel %vm628_vm1, %v782_v26, -inf }
 0x2fb   :  { %793 = vmax.xlane.f32.xlu2 %v792_v29  ;;  %799 = vmax.xlane.f32.xlu1 %v798_v27  ;;  %v720_v30 = vpop.f32.mrf.mxu1 }
 0x2fc   :  { %v785_v31 = vmul.f32 0.35355338, %v720_v30 }
 0x2fe   :  { %v801_v34 = vsel %vm628_vm1, %v785_v31, -inf }
 0x2ff   :  { %v665_v32 = vpop.f32.mrf.mxu2 }
 0x301   :  { %v758_v33 = vpop.f32.mrf.mxu3 }
 0x302   :  { %v787_v35 = vmul.f32 0.35355338, %v758_v33 }
 0x303   :  { %802 = vmax.xlane.f32.xlu2 %v801_v34  ;;  %v722_v36 = vpop.f32.mrf.mxu1  ;;  %v777_v37 = vpop.f32.mrf.mxu0 }
 0x304   :  { %v807_v38 = vsel %vm628_vm1, %v787_v35, -inf  ;;  %v788_v44 = vmul.f32 0.35355338, %v777_v37 }
 0x305   :  { %808 = vmax.xlane.f32.xlu1 %v807_v38 }
 0x306   :  { %v810_v46 = vsel %vm628_vm1, %v788_v44, -inf }
 0x309   :  { %v739_v39 = vpop.f32.mrf.mxu2  ;;  %v760_v40 = vpop.f32.mrf.mxu3 }
 0x30a   :  { %v786_v41 = vmul.f32 0.35355338, %v739_v39 }
 0x30b   :  { %v779_v42 = vpop.f32.mrf.mxu0 }
 0x30c   :  { %v804_v43 = vsel %vm628_vm1, %v786_v41, -inf }
 0x30d   :  { %805 = vmax.xlane.f32.xlu2 %v804_v43 }
 0x311   :  { %v741_v45 = vpop.f32.mrf.mxu2 }
 0x315   :  { %811 = vmax.xlane.f32.xlu2 %v810_v46 }
 0x33f   :  { %460 = vxpose.xlu1.b32.start [1/2] (short) (narrow) %v1381_v48, 32 }
 0x347   :  { %461 = vxpose.xlu1.b32.end [2/2] (short) (narrow) %v1382_v49, 32 }
 0x360   :  { %v791_v50 = vpop.xlane.xlu0 %790 }
 0x361   :  { %v813_v51 = vsub.f32 %v781_v16, %v791_v50 }
 0x363   :  { %v821_v52 = vmul.f32 1.442695, %v813_v51 }
 0x365   :  { %1427 = vpow2.f32 %v821_v52 }
 0x366   :  { %v797_v53 = vpop.xlane.xlu1 %796 }
 0x367   :  { %v815_v54 = vsub.f32 %v783_v19, %v797_v53 }
 0x369   :  { %v825_v55 = vmul.f32 1.442695, %v815_v54 }
 0x36b   :  { %v1645_v56 = vpop.eup %1427  ;;  %1429 = vpow2.f32 %v825_v55 }
 0x36c   :  { %v837_v57 = vsel %vm628_vm1, %v1645_v56, 0.0 }
 0x36d   :  { %838 = vadd.xlane.f32.xlu2 %v837_v57 }
 0x36e   :  { %v794_v58 = vpop.xlane.xlu2 %793  ;;  %v800_v59 = vpop.xlane.xlu1 %799 }
 0x36f   :  { %v814_v60 = vsub.f32 %v782_v26, %v794_v58  ;;  %v816_v61 = vsub.f32 %v784_v23, %v800_v59 }
 0x371   :  { %v1649_v62 = vpop.eup %1429  ;;  %v823_v63 = vmul.f32 1.442695, %v814_v60  ;;  %v827_v0 = vmul.f32 1.442695, %v816_v61 }
 0x372   :  { %v843_v1 = vsel %vm628_vm1, %v1649_v62, 0.0 }
 0x373   :  { %1431 = vpow2.f32 %v823_v63  ;;  %844 = vadd.xlane.f32.xlu0 %v843_v1 }
 0x374   :  { %1433 = vpow2.f32 %v827_v0 }
 0x376   :  { %v803_v2 = vpop.xlane.xlu2 %802 }
 0x377   :  { %v817_v3 = vsub.f32 %v785_v31, %v803_v2 }
 0x378   :  { %v809_v6 = vpop.xlane.xlu1 %808 }
 0x379   :  { %v1653_v4 = vpop.eup %1431  ;;  %v829_v5 = vmul.f32 1.442695, %v817_v3  ;;  %v819_v8 = vsub.f32 %v787_v35, %v809_v6 }
 0x37a   :  { %v1655_v7 = vpop.eup %1433  ;;  %v840_v9 = vsel %vm628_vm1, %v1653_v4, 0.0 }
 0x37b   :  { %1435 = vpow2.f32 %v829_v5  ;;  %v846_v10 = vsel %vm628_vm1, %v1655_v7, 0.0  ;;  %841 = vadd.xlane.f32.xlu2 %v840_v9  ;;  %v833_v11 = vmul.f32 1.442695, %v819_v8 }
 0x37c   :  { %847 = vadd.xlane.f32.xlu0 %v846_v10 }
 0x37d   :  { %1437 = vpow2.f32 %v833_v11 }
 0x380   :  { %v806_v13 = vpop.xlane.xlu2 %805 }
 0x381   :  { %v1661_v12 = vpop.eup %1435  ;;  %v818_v14 = vsub.f32 %v786_v41, %v806_v13 }
 0x382   :  { %v849_v15 = vsel %vm628_vm1, %v1661_v12, 0.0 }
 0x383   :  { %850 = vadd.xlane.f32.xlu2 %v849_v15  ;;  %v1665_v16 = vpop.eup %1437  ;;  %v831_v17 = vmul.f32 1.442695, %v818_v14 }
 0x384   :  { %v855_v18 = vsel %vm628_vm1, %v1665_v16, 0.0 }
 0x385   :  { %1439 = vpow2.f32 %v831_v17  ;;  %856 = vadd.xlane.f32.xlu0 %v855_v18 }
 0x388   :  { %v812_v19 = vpop.xlane.xlu2 %811 }
 0x389   :  { %v820_v20 = vsub.f32 %v788_v44, %v812_v19 }
 0x38b   :  { %v1669_v21 = vpop.eup %1439  ;;  %v835_v22 = vmul.f32 1.442695, %v820_v20 }
 0x38c   :  { %v852_v23 = vsel %vm628_vm1, %v1669_v21, 0.0 }
 0x38d   :  { %1441 = vpow2.f32 %v835_v22  ;;  %853 = vadd.xlane.f32.xlu2 %v852_v23 }
 0x393   :  { %v1673_v24 = vpop.eup %1441 }
 0x394   :  { %v858_v25 = vsel %vm628_vm1, %v1673_v24, 0.0 }
 0x395   :  { %859 = vadd.xlane.f32.xlu0 %v858_v25 }
 0x3e0   :  { %v839_v32 = vpop.xlane.xlu2 %838 }
 0x3e1   :  { %1443 = vrcp.f32 %v839_v32 }
 0x3e3   :  { %v476_v26 = vpop.trf.xlu1 }
 0x3e6   :  { %v845_v35 = vpop.xlane.xlu0 %844 }
 0x3e7   :  { %1445 = vrcp.f32 %v845_v35  ;;  %v1444_v37 = vpop.eup %1443 }
 0x3e8   :  { %v869_v43 = vmul.f32 %v1444_v37, %v1645_v56 }
 0x3ea   :  { %v877_v50 = vpack.c.bf16 %v869_v43, %v869_v43 }
 0x3eb   :  { %v477_v27 = vpop.trf.xlu1 }
 0x3ec   :  { %v1383_v28 = vpack.i.bf16 %v477_v27, %v476_v26 }
 0x3ed   :  { %v1446_v39 = vpop.eup %1445 }
 0x3ee   :  { %1384 = vxpose.xlu2.b32.start.end [1/1] (short) (narrow) %v1383_v28, 16  ;;  %v842_v33 = vpop.xlane.xlu2 %841  ;;  %v871_v44 = vmul.f32 %v1446_v39, %v1649_v62 }
 0x3ef   :  { %v848_v38 = vpop.xlane.xlu0 %847  ;;  %1447 = vrcp.f32 %v842_v33 }
 0x3f0   :  { %1449 = vrcp.f32 %v848_v38  ;;  %v879_v51 = vpack.c.bf16 %v871_v44, %v871_v44 }
 0x3f3   :  { %v478_v29 = vpop.trf.xlu1 }
 0x3f5   :  { %v1448_v49 = vpop.eup %1447 }
 0x3f6   :  { %v851_v34 = vpop.xlane.xlu2 %850  ;;  %v1450_v52 = vpop.eup %1449  ;;  %v870_v57 = vmul.f32 %v1448_v49, %v1653_v4 }
 0x3f7   :  { %v872_v56 = vmul.f32 %v1450_v52, %v1655_v7  ;;  %1451 = vrcp.f32 %v851_v34 }
 0x3f8   :  { %v857_v58 = vpop.xlane.xlu0 %856  ;;  %v878_v0 = vpack.c.bf16 %v870_v57, %v870_v57 }
 0x3f9   :  { %v880_v63 = vpack.c.bf16 %v872_v56, %v872_v56  ;;  %1453 = vrcp.f32 %v857_v58 }
 0x3fb   :  { %v479_v30 = vpop.trf.xlu1 }
 0x3fc   :  { %v1395_v31 = vpack.i.bf16 %v479_v30, %v478_v29 }
 0x3fd   :  { %v1452_v2 = vpop.eup %1451 }
 0x3fe   :  { %1396 = vxpose.xlu0.b32.start.end [1/1] (short) (narrow) %v1395_v31, 16  ;;  %v873_v7 = vmul.f32 %v1452_v2, %v1661_v12 }
 0x3ff   :  { %v1454_v3 = vpop.eup %1453 }
 0x400   :  { %v854_v36 = vpop.xlane.xlu2 %853  ;;  %v875_v8 = vmul.f32 %v1454_v3, %v1665_v16  ;;  %v881_v15 = vpack.c.bf16 %v873_v7, %v873_v7 }
 0x401   :  { %1455 = vrcp.f32 %v854_v36 }
 0x402   :  { %v883_v17 = vpack.c.bf16 %v875_v8, %v875_v8 }
 0x407   :  { %v1456_v14 = vpop.eup %1455 }
 0x408   :  { %v860_v1 = vpop.xlane.xlu0 %859  ;;  %v874_v12 = vmul.f32 %v1456_v14, %v1669_v21 }
 0x409   :  { %1457 = vrcp.f32 %v860_v1 }
 0x40a   :  { %v882_v28 = vpack.c.bf16 %v874_v12, %v874_v12 }
 0x40f   :  { %v1458_v18 = vpop.eup %1457 }
 0x410   :  { %v876_v16 = vmul.f32 %v1458_v18, %v1673_v24 }
 0x412   :  { %v884_v29 = vpack.c.bf16 %v876_v16, %v876_v16 }
 0x487   :  { %v1385_v40 = vpop.trf.xlu2 }
 0x488   :  { %v1389_v41 = vunpack.i.h.bf16 %v1385_v40  ;;  %v1386_v42 = vunpack.i.l.bf16 %v1385_v40 }
 0x48a   :  { %v620_v45 = vpack.c.bf16 %v1386_v42, %v1386_v42  ;;  %v622_v46 = vpack.c.bf16 %v1389_v41, %v1389_v41 }
 0x48c   :  { %v890_v47 = vsel %vm888_vm2, %v620_v45, 0  ;;  %v928_v48 = vsel %vm888_vm2, %v622_v46, 0 }
 0x48d   :  { %899 = vmatpush.bf16.msra.mxu1 %v890_v47  ;;  %937 = vmatpush.bf16.msra.mxu3 %v928_v48 }
 0x48f   :  { %v1390_v53 = vpop.trf.xlu2 }
 0x490   :  { %v1394_v54 = vunpack.i.h.bf16 %v1390_v53  ;;  %v1391_v55 = vunpack.i.l.bf16 %v1390_v53  ;;  %1275 = vmatmul.msk.bf16.vlgmr.msra.gmra.mxu1 %vm628_vm1, %v877_v50  ;;  %1277 = vmatmul.msk.bf16.vlgmr.msra.gmra.mxu3 %vm628_vm1, %v879_v51 }
 0x492   :  { %v621_v59 = vpack.c.bf16 %v1391_v55, %v1391_v55  ;;  %v623_v60 = vpack.c.bf16 %v1394_v54, %v1394_v54  ;;  %v1295_v54 = vld [vmem:[#allocation7 + $0x8] sm:$0xff]  ;;  %v1294_v55 = vld [vmem:[#allocation7] sm:$0xff] }
 0x494   :  { %v909_v61 = vsel %vm888_vm2, %v621_v59, 0  ;;  %v947_v62 = vsel %vm888_vm2, %v623_v60, 0  ;;  %v1426_v59 = vld [vmem:[%s1717_s4] ss:$0 sm:$0xff] }
 0x495   :  { %918 = vmatpush.bf16.msra.mxu2 %v909_v61  ;;  %956 = vmatpush.bf16.msrb.mxu0 %v947_v62 }
 0x498   :  { %1276 = vmatmul.msk.bf16.vlgmr.msra.gmra.mxu2 %vm628_vm1, %v878_v0  ;;  %1278 = vmatmul.msk.bf16.vlgmr.msrb.gmra.mxu0 %vm628_vm1, %v880_v63 }
 0x4a2   :  { %v1397_v4 = vpop.trf.xlu0 }
 0x4a3   :  { %v1401_v5 = vunpack.i.h.bf16 %v1397_v4  ;;  %v1398_v6 = vunpack.i.l.bf16 %v1397_v4 }
 0x4a5   :  { %v624_v9 = vpack.c.bf16 %v1398_v6, %v1398_v6  ;;  %v626_v10 = vpack.c.bf16 %v1401_v5, %v1401_v5 }
 0x4a7   :  { %v966_v11 = vsel %vm888_vm2, %v624_v9, 0  ;;  %v1004_v13 = vsel %vm888_vm2, %v626_v10, 0 }
 0x4a8   :  { %975 = vmatpush.bf16.msrb.mxu1 %v966_v11  ;;  %1013 = vmatpush.bf16.msrb.mxu3 %v1004_v13 }
 0x4aa   :  { %v1402_v19 = vpop.trf.xlu0 }
 0x4ab   :  { %v1406_v20 = vunpack.i.h.bf16 %v1402_v19  ;;  %v1403_v22 = vunpack.i.l.bf16 %v1402_v19  ;;  %1279 = vmatmul.msk.bf16.vlgmr.msrb.gmra.mxu1 %vm628_vm1, %v881_v15  ;;  %1281 = vmatmul.msk.bf16.vlgmr.msrb.gmra.mxu3 %vm628_vm1, %v883_v17 }
 0x4ac   :  { %1228 = vmatpush.bf16.msra.mxu1 %v1295_v54 }
 0x4ad   :  { %v625_v23 = vpack.c.bf16 %v1403_v22, %v1403_v22  ;;  %v627_v25 = vpack.c.bf16 %v1406_v20, %v1406_v20 }
 0x4af   :  { %v985_v26 = vsel %vm888_vm2, %v625_v23, 0  ;;  %v1023_v27 = vsel %vm888_vm2, %v627_v25, 0 }
 0x4b0   :  { %994 = vmatpush.bf16.msrb.mxu2 %v985_v26  ;;  %1032 = vmatpush.bf16.msra.mxu0 %v1023_v27 }
 0x4b1   :  { %1229 = vmatpush.bf16.msra.mxu1 %v1294_v55 }
 0x4b3   :  { %1280 = vmatmul.msk.bf16.vlgmr.msrb.gmra.mxu2 %vm628_vm1, %v882_v28  ;;  %1282 = vmatmul.msk.bf16.vlgmr.msra.gmra.mxu0 %vm628_vm1, %v884_v29 }
 0x50d   :  { %v901_v30 = vpop.f32.mrf.mxu1 }
 0x513   :  { %v939_v31 = vpop.f32.mrf.mxu3 }
 0x514   :  { %v1407_v32 = vpack.i.bf16 %v939_v31, %v901_v30 }
 0x515   :  { %v903_v21 = vpop.f32.mrf.mxu1  ;;  %v958_v33 = vpop.f32.mrf.mxu0 }
 0x516   :  { %1408 = vxpose.xlu2.b32.start [1/2] (short) (narrow) %v1407_v32, 8 }
 0x51b   :  { %v920_v24 = vpop.f32.mrf.mxu2  ;;  %v941_v34 = vpop.f32.mrf.mxu3 }
 0x51c   :  { %v1409_v35 = vpack.i.bf16 %v958_v33, %v920_v24 }
 0x51d   :  { %v960_v36 = vpop.f32.mrf.mxu0 }
 0x51e   :  { %1410 = vxpose.xlu2.b32.end [2/2] (short) (narrow) %v1409_v35, 8 }
 0x523   :  { %v922_v37 = vpop.f32.mrf.mxu2 }
 0x528   :  { %v977_v38 = vpop.f32.mrf.mxu1 }
 0x52e   :  { %v1015_v39 = vpop.f32.mrf.mxu3 }
 0x52f   :  { %v1416_v40 = vpack.i.bf16 %v1015_v39, %v977_v38 }
 0x530   :  { %v979_v41 = vpop.f32.mrf.mxu1  ;;  %v1034_v42 = vpop.f32.mrf.mxu0 }
 0x531   :  { %1417 = vxpose.xlu0.b32.start [1/2] (short) (narrow) %v1416_v40, 8 }
 0x536   :  { %v996_v43 = vpop.f32.mrf.mxu2  ;;  %v1017_v44 = vpop.f32.mrf.mxu3 }
 0x537   :  { %v1418_v45 = vpack.i.bf16 %v1034_v42, %v996_v43 }
 0x538   :  { %v1036_v46 = vpop.f32.mrf.mxu0 }
 0x539   :  { %1419 = vxpose.xlu0.b32.end [2/2] (short) (narrow) %v1418_v45, 8 }
 0x53e   :  { %v998_v47 = vpop.f32.mrf.mxu2 }
 0x5af   :  { %v1411_v48 = vpop.trf.xlu2 }
 0x5b0   :  { %v1412_v49 = vunpack.i.l.bf16 %v1411_v48  ;;  %v1415_v50 = vunpack.i.h.bf16 %v1411_v48 }
 0x5b2   :  { %1166 = vxpose.xlu1.b32.start [1/4] (short) (narrow) %v1412_v49, 16 }
 0x5ba   :  { %1167 = vxpose.xlu1.b32.cont [2/4] (short) (narrow) %v1415_v50, 16 }
 0x5d5   :  { %v1420_v51 = vpop.trf.xlu0 }
 0x5d6   :  { %v1421_v52 = vunpack.i.l.bf16 %v1420_v51  ;;  %v1424_v53 = vunpack.i.h.bf16 %v1420_v51 }
 0x5d8   :  { %1168 = vxpose.xlu1.b32.cont [3/4] (short) (narrow) %v1421_v52, 16 }
 0x5e0   :  { %1169 = vxpose.xlu1.b32.end [4/4] (short) (narrow) %v1424_v53, 16 }
 0x66c   :  { %v1182_v56 = vpop.trf.xlu1 }
 0x674   :  { %v1183_v57 = vpop.trf.xlu1 }
 0x675   :  { %v1198_v58 = vpack.c.bf16 %v1183_v57, %v1182_v56 }
 0x677   :  { %1291 = vmatmul.msk.bf16.vlgmr.msra.gmra.mxu1 %vm92_vm0, %v1198_v58 }
 0x6f4   :  { %v1231_v60 = vpop.f32.mrf.mxu1 }
 0x6f5   :  { %v1232_v61 = vadd.f32 %v1426_v59, %v1231_v60 }
 0x6f7   :  { %1236 = vst.msk [vmem:[#allocation8] sm:$0xff] %vm92_vm0, %v1232_v61 }
 0x6fc   :  { %v1233_v62 = vpop.f32.mrf.mxu1 }
 0x6fd   :  { %v1234_v63 = vadd.f32 %v1426_v59, %v1233_v62 }
 0x6ff   :  { %1237 = vst.msk [vmem:[#allocation8 + $0x8] sm:$0xff] %vm92_vm0, %v1234_v63 }
 0x700   :  { %1250 = dma.vmem_to_hbm [thread:$0]  %s1243_s14, 256, %s1245_s17, [#allocation4], %s1565_s30, %s1565_s30, %s1566_s1  }
 0x701   :  { %1559 = dma.done.wait [#allocation4], 256  }
 0x702   :  { %1560 = vsyncadd [#allocation4], 4294967040 }
 0x703   :  { %1255 = vsyncpa [#allocation3], 1 }
 0x704   :  { %1256 = vsyncpa [#allocation6], 1 }
 0x705   :  { %1257 = vsyncpa [#allocation4], 1 }

</bundles_post_ra>
